<compile_context>
chip_gen: v5e
topology: v5e:2x2
jax: 0.10.0
libtpu: 0.0.40
codegen_flags: <defaults>
</compile_context>

<pallas_src>
import functools

import jax
import jax.numpy as jnp
import numpy as np
from jax import lax
from jax.experimental import pallas as pl
from jax.experimental.pallas import tpu as pltpu


def _round_up(n, m):
    return ((n + m - 1) // m) * m


def _pick_time_tile(T, D, itemsize, *, max_rows=2048, target_bytes=2 << 20):
    """Largest sublane-aligned time tile keeping one x tile <= target_bytes."""
    sub = 16 if itemsize == 2 else 8          # bf16 packs 16 rows / sublane tile
    rows = max(1, target_bytes // max(1, D * itemsize))
    rows = min(rows, max_rows, _round_up(T, sub))
    rows = max(sub, (rows // sub) * sub)
    return rows


# ----------------------------------------------------------------------------
# Kernel: per (batch, time-tile) grid step, layer-normalize a lane-dense
# (Tt, D) tile and apply the (pre-computed) per-batch scale/bias rows.
# Purely HBM-bound: one tile in, one tile out.
# ----------------------------------------------------------------------------
def _cln_kernel(x_ref, scale_ref, bias_ref, o_ref, *, eps, inv_d):
    x = x_ref[...].astype(jnp.float32)                       # (Tt, D)

    # One-pass stats: the two row reductions are independent (overlap on XLU).
    s = jnp.sum(x, axis=-1, keepdims=True)
    s2 = jnp.sum(x * x, axis=-1, keepdims=True)
    mean = s * inv_d
    var = jnp.maximum(s2 * inv_d - mean * mean, 0.0)          # guard tiny negatives
    y = (x - mean) * lax.rsqrt(var + eps)                     # rsqrt -> EUP slot

    scale = scale_ref[...]                                     # (1, D) f32
    bias = bias_ref[...]                                       # (1, D) f32
    o_ref[...] = (y * scale + bias).astype(o_ref.dtype)


def conditional_layer_norm(x, emo, w_scale, b_scale, w_bias, b_bias,
                           *, eps=1e-5, time_tile=None):
    """Fused ConditionalLayerNorm forward.

    x:        (B, T, D)  activations, f32 or bf16 (output matches x.dtype)
    emo:      (B, D)     emotion embedding
    w_scale:  (D, D)     PyTorch nn.Linear layout (out_features, in_features)
    b_scale:  (D,)
    w_bias:   (D, D)
    b_bias:   (D,)
    """
    B, T, D = x.shape
    f32 = jnp.float32

    # Hoisted conditional projections: batched, MXU-efficient matmuls outside
    # the kernel (tiny vs. the LN's HBM traffic, and fully overlapped by XLA).
    scale = emo.astype(f32) @ w_scale.astype(f32).T + b_scale.astype(f32)   # (B, D)
    bias = emo.astype(f32) @ w_bias.astype(f32).T + b_bias.astype(f32)      # (B, D)
    scale3 = scale.reshape(B, 1, D)     # keep the (8,128) block rule trivially happy
    bias3 = bias.reshape(B, 1, D)

    tt = time_tile if time_tile is not None else _pick_time_tile(
        T, D, jnp.dtype(x.dtype).itemsize)
    grid = (B, pl.cdiv(T, tt))          # masked remainder tile, no T % tt assert

    kern = functools.partial(_cln_kernel, eps=float(eps), inv_d=1.0 / D)
    return pl.pallas_call(
        kern,
        out_shape=jax.ShapeDtypeStruct((B, T, D), x.dtype),
        grid=grid,
        in_specs=[
            pl.BlockSpec((pl.Squeezed(), tt, D), lambda b, t: (b, t, 0)),  # x tile
            pl.BlockSpec((pl.Squeezed(), 1, D), lambda b, t: (b, 0, 0)),   # scale row
            pl.BlockSpec((pl.Squeezed(), 1, D), lambda b, t: (b, 0, 0)),   # bias row
        ],
        out_specs=pl.BlockSpec((pl.Squeezed(), tt, D), lambda b, t: (b, t, 0)),
        # No carried state -> both axes independent; v7x megacore can shard either.
        compiler_params=pltpu.CompilerParams(
            dimension_semantics=("parallel", "parallel")),
    )(x, scale3, bias3)


# ----------------------------------------------------------------------------
# Pure-JAX reference (mirrors the PyTorch forward exactly)
# ----------------------------------------------------------------------------
def reference_cln(x, emo, w_scale, b_scale, w_bias, b_bias, eps=1e-5):
    f32 = jnp.float32
    xf = x.astype(f32)
    mean = jnp.mean(xf, axis=-1, keepdims=True)
    var = jnp.mean((xf - mean) ** 2, axis=-1, keepdims=True)
    y = (xf - mean) / jnp.sqrt(var + eps)
    scale = emo.astype(f32) @ w_scale.astype(f32).T + b_scale.astype(f32)
    bias = emo.astype(f32) @ w_bias.astype(f32).T + b_bias.astype(f32)
    return y * scale[:, None, :] + bias[:, None, :]


if __name__ == "__main__":
    B, T, D = 2, 20, 256        # T deliberately NOT a multiple of 8 -> masked last tile
    key = jax.random.PRNGKey(0)
    kx, ke, k1, k2, k3, k4 = jax.random.split(key, 6)

    x = jax.random.normal(kx, (B, T, D), jnp.float32)
    emo = jax.random.normal(ke, (B, D), jnp.float32)

    # --- check 1: random parameters (exercises the conditional path) ---
    params_rand = dict(
        w_scale=jax.random.normal(k1, (D, D), jnp.float32) * 0.05,
        b_scale=jax.random.normal(k2, (D,), jnp.float32) * 0.01 + 1.0,
        w_bias=jax.random.normal(k3, (D, D), jnp.float32) * 0.05,
        b_bias=jax.random.normal(k4, (D,), jnp.float32) * 0.01,
    )
    out = jax.block_until_ready(conditional_layer_norm(x, emo, **params_rand))
    ref = reference_cln(x, emo, **params_rand)
    np.testing.assert_allclose(np.asarray(out), np.asarray(ref), rtol=1e-5, atol=1e-5)

    # --- check 2: the module's reset_parameters() init (W=0, b_scale=1, b_bias=0) ---
    params_init = dict(
        w_scale=jnp.zeros((D, D), jnp.float32),
        b_scale=jnp.ones((D,), jnp.float32),
        w_bias=jnp.zeros((D, D), jnp.float32),
        b_bias=jnp.zeros((D,), jnp.float32),
    )
    out2 = jax.block_until_ready(conditional_layer_norm(x, emo, **params_init))
    ref2 = reference_cln(x, emo, **params_init)
    np.testing.assert_allclose(np.asarray(out2), np.asarray(ref2), rtol=1e-5, atol=1e-5)

    # --- check 3: bf16 I/O path (half the HBM bytes; math stays f32 in-kernel) ---
    x_bf = x.astype(jnp.bfloat16)
    out3 = jax.block_until_ready(conditional_layer_norm(x_bf, emo, **params_rand))
    ref3 = reference_cln(x_bf, emo, **params_rand)
    np.testing.assert_allclose(np.asarray(out3, np.float32), np.asarray(ref3),
                               rtol=5e-2, atol=5e-2)

    # --- check 4: forced small time tile -> multi-step grid with a remainder tile ---
    T2 = 40
    x2 = jax.random.normal(jax.random.PRNGKey(1), (B, T2, D), jnp.float32)
    out4 = jax.block_until_ready(
        conditional_layer_norm(x2, emo, time_tile=16, **params_rand))
    ref4 = reference_cln(x2, emo, **params_rand)
    np.testing.assert_allclose(np.asarray(out4), np.asarray(ref4), rtol=1e-5, atol=1e-5)

    print("KERNEL_OK")
</pallas_src>

<mosaic_0001>
module attributes {stable_mosaic.version = 11 : i64} {
  func.func @_cln_kernel(%arg0: i32, %arg1: i32, %arg2: memref<1x24x256xf32, #tpu.memory_space<vmem>>, %arg3: memref<1x1x256xf32, #tpu.memory_space<vmem>>, %arg4: memref<1x1x256xf32, #tpu.memory_space<vmem>>, %arg5: memref<1x24x256xf32, #tpu.memory_space<vmem>>) attributes {dimension_semantics = [#tpu.dimension_semantics<parallel>, #tpu.dimension_semantics<parallel>], iteration_bounds = array<i64: 2, 1>, scalar_prefetch = 0 : i64, scratch_operands = 0 : i64, tpu.core_type = #tpu.core_type<tc>, window_params = [{transform_indices = @transform_0, window_bounds = array<i64: 1, 24, 256>}, {transform_indices = @transform_1, window_bounds = array<i64: 1, 1, 256>}, {transform_indices = @transform_2, window_bounds = array<i64: 1, 1, 256>}, {transform_indices = @transform_3, window_bounds = array<i64: 1, 24, 256>}]} {
    %c0 = arith.constant 0 : index
    %c0_0 = arith.constant 0 : index
    %c0_1 = arith.constant 0 : index
    %0 = vector.load %arg2[%c0, %c0_0, %c0_1] : memref<1x24x256xf32, #tpu.memory_space<vmem>>, vector<1x24x256xf32>
    %1 = vector.shape_cast %0 : vector<1x24x256xf32> to vector<24x256xf32>
    %cst = arith.constant dense<0.000000e+00> : vector<24xf32>
    %2 = vector.multi_reduction <add>, %1, %cst [1] : vector<24x256xf32> to vector<24xf32>
    %3 = vector.shape_cast %2 : vector<24xf32> to vector<24x1xf32>
    %4 = arith.mulf %1, %1 : vector<24x256xf32>
    %cst_2 = arith.constant dense<0.000000e+00> : vector<24xf32>
    %5 = vector.multi_reduction <add>, %4, %cst_2 [1] : vector<24x256xf32> to vector<24xf32>
    %6 = vector.shape_cast %5 : vector<24xf32> to vector<24x1xf32>
    %cst_3 = arith.constant 3.906250e-03 : f32
    %7 = vector.broadcast %cst_3 : f32 to vector<24x1xf32>
    %8 = arith.mulf %3, %7 : vector<24x1xf32>
    %cst_4 = arith.constant 3.906250e-03 : f32
    %9 = vector.broadcast %cst_4 : f32 to vector<24x1xf32>
    %10 = arith.mulf %6, %9 : vector<24x1xf32>
    %11 = arith.mulf %8, %8 : vector<24x1xf32>
    %12 = arith.subf %10, %11 : vector<24x1xf32>
    %cst_5 = arith.constant 0.000000e+00 : f32
    %13 = vector.broadcast %cst_5 : f32 to vector<24x1xf32>
    %14 = arith.maximumf %12, %13 : vector<24x1xf32>
    %15 = vector.broadcast %8 : vector<24x1xf32> to vector<24x256xf32>
    %16 = arith.subf %1, %15 : vector<24x256xf32>
    %cst_6 = arith.constant 9.99999974E-6 : f32
    %17 = vector.broadcast %cst_6 : f32 to vector<24x1xf32>
    %18 = arith.addf %14, %17 : vector<24x1xf32>
    %19 = math.rsqrt %18 : vector<24x1xf32>
    %20 = vector.broadcast %19 : vector<24x1xf32> to vector<24x256xf32>
    %21 = arith.mulf %16, %20 : vector<24x256xf32>
    %c0_7 = arith.constant 0 : index
    %c0_8 = arith.constant 0 : index
    %c0_9 = arith.constant 0 : index
    %22 = vector.load %arg3[%c0_7, %c0_8, %c0_9] : memref<1x1x256xf32, #tpu.memory_space<vmem>>, vector<1x1x256xf32>
    %23 = vector.shape_cast %22 : vector<1x1x256xf32> to vector<1x256xf32>
    %c0_10 = arith.constant 0 : index
    %c0_11 = arith.constant 0 : index
    %c0_12 = arith.constant 0 : index
    %24 = vector.load %arg4[%c0_10, %c0_11, %c0_12] : memref<1x1x256xf32, #tpu.memory_space<vmem>>, vector<1x1x256xf32>
    %25 = vector.shape_cast %24 : vector<1x1x256xf32> to vector<1x256xf32>
    %26 = vector.broadcast %23 : vector<1x256xf32> to vector<24x256xf32>
    %27 = arith.mulf %21, %26 : vector<24x256xf32>
    %28 = vector.broadcast %25 : vector<1x256xf32> to vector<24x256xf32>
    %29 = arith.addf %27, %28 : vector<24x256xf32>
    %c0_13 = arith.constant 0 : index
    %c0_14 = arith.constant 0 : index
    %c0_15 = arith.constant 0 : index
    %30 = vector.load %arg5[%c0_13, %c0_14, %c0_15] : memref<1x24x256xf32, #tpu.memory_space<vmem>>, vector<1x24x256xf32>
    %31 = vector.shape_cast %30 : vector<1x24x256xf32> to vector<24x256xf32>
    %32 = vector.shape_cast %29 : vector<24x256xf32> to vector<1x24x256xf32>
    tpu.vector_store %arg5[%c0_13, %c0_14, %c0_15], %32 {strides = array<i32>} : memref<1x24x256xf32, #tpu.memory_space<vmem>>, vector<1x24x256xf32>,
    return
  }
  func.func @transform_0(%arg0: i32, %arg1: i32) -> (i32, i32, i32) {
    %c0_i32 = arith.constant 0 : i32
    %c0_i32_0 = arith.constant 0 : i32
    return %arg0, %arg1, %c0_i32 : i32, i32, i32
  }
  func.func @transform_1(%arg0: i32, %arg1: i32) -> (i32, i32, i32) {
    %c0_i32 = arith.constant 0 : i32
    %c0_i32_0 = arith.constant 0 : i32
    %c0_i32_1 = arith.constant 0 : i32
    return %arg0, %c0_i32, %c0_i32_0 : i32, i32, i32
  }
  func.func @transform_2(%arg0: i32, %arg1: i32) -> (i32, i32, i32) {
    %c0_i32 = arith.constant 0 : i32
    %c0_i32_0 = arith.constant 0 : i32
    %c0_i32_1 = arith.constant 0 : i32
    return %arg0, %c0_i32, %c0_i32_0 : i32, i32, i32
  }
  func.func @transform_3(%arg0: i32, %arg1: i32) -> (i32, i32, i32) {
    %c0_i32 = arith.constant 0 : i32
    %c0_i32_0 = arith.constant 0 : i32
    return %arg0, %arg1, %c0_i32 : i32, i32, i32
  }
}

</mosaic_0001>

<bundles_post_ra>
// kernel: tpu_custom_call.1
= control target key start
LH: loop header
LB: loop body
LE: loop exit
PB: predicated region body
PF: predicated region fallthrough
CT: control target
= control target key end

     0   :  { %s575_s12 = smov 0   ;;  %s577_s13 = smov 0   ;;  %s670_s0 = inlined_call_operand.vmem [shape: f32[2,20,256], index: 0, kind: input, shape index: {}]   ;;  %s671_s1 = inlined_call_operand.vmem [shape: f32[2,1,256], index: 1, kind: input, shape index: {}]   ;;  %s672_s2 = inlined_call_operand.vmem [shape: f32[2,1,256], index: 2, kind: input, shape index: {}]   ;;  %s673_s3 = inlined_call_operand.vmem [shape: f32[2,20,256], index: 3, kind: output, shape index: {}]  }
   0x1   :  { %s579_s14 = smov 0  }
   0x2 LB: > { %s25_s15 = sadd.s32 1, %s549_s13  ;;  %p493_p0 = scmp.ge.s32.totalorder %s553_s14, 1  ;;  %s553_s14 = sphi %s579_s14, %s13_s14   ;;  %s549_s13 = sphi %s577_s13, %s675_s13   ;;  %s545_s12 = sphi %s575_s12, %s674_s12  }
   0x3   : > { %p27_p1 = scmp.ge.s32.totalorder %s25_s15, 2  ;;  %p177_p2 = scmp.lt.s32.totalorder %s553_s14, 3 }
   0x5   : > { %s677_s15 = smov (%p27_p1, %s25_s15), 0  ;;  %p178_p3 = pnand %p493_p0, %p177_p2 }
   0x6   : > { %p220_p4 = scmp.lt.s32.totalorder (!%p178_p3), %s545_s12, 1 }
   0x7   : > { %181 = sbr.rel (%p178_p3) target bundleno = 182 (0xb6), region = 32 }
   0xc   : > { %s679_s12 = smov (!%p220_p4, %s545_s12), 1 }
   0xd   : > { %s500_s16 = smul.u32 48, %s679_s12  ;;  %s495_s20 = sshll.u32 %s679_s12, 1 }
   0xe   : > { %s233_s23 = scalar_lea.vmem %s671_s1, %s495_s20  ;;  %s237_s26 = scalar_lea.vmem %s672_s2, %s495_s20 }
   0xf   : > { %s228_s19 = scalar_lea.vmem %s670_s0, %s500_s16  ;;  %v339_v50 = vld [vmem:[%s233_s23] sm:$0x3]  ;;  %s247_s29 = scalar_lea.vmem %s673_s3, %s500_s16 }
  0x10   : > { %v601_v0 = vld [vmem:[%s228_s19 + $0x20] sm:$0xff]  ;;  %v603_v1 = vld [vmem:[%s228_s19 + $0x28] sm:$0xff]  ;;  %v611_v5 = vld [vmem:[%s228_s19 + $0x10] sm:$0xff]  ;;  %v342_v60 = vperm.slane %v339_v50, 0  ;;  %v343_v62 = vperm.slane %v339_v50, 1 }
  0x11   : > { %v605_v2 = vld [vmem:[%s228_s19] sm:$0xff]  ;;  %v261_v3 = vadd.f32 %v603_v1, %v601_v0  ;;  %v609_v4 = vld [vmem:[%s228_s19 + $0x8] sm:$0xff]  ;;  %v613_v6 = vld [vmem:[%s228_s19 + $0x18] sm:$0xff]  ;;  %v266_v8 = vmul.f32 %v611_v5, %v611_v5  ;;  %v268_v13 = vmul.f32 %v601_v0, %v601_v0  ;;  %v269_v14 = vmul.f32 %v603_v1, %v603_v1 }
  0x12   : > { %v255_v7 = vadd.f32 %v609_v4, %v605_v2  ;;  %v267_v9 = vmul.f32 %v613_v6, %v613_v6  ;;  %v264_v10 = vmul.f32 %v605_v2, %v605_v2  ;;  %v265_v11 = vmul.f32 %v609_v4, %v609_v4  ;;  %v340_v53 = vld [vmem:[%s237_s26] sm:$0x3] }
  0x13   : > { %262 = vadd.xlane.f32.xlu1 %v261_v3  ;;  %v258_v16 = vadd.f32 %v613_v6, %v611_v5  ;;  %v276_v17 = vadd.f32 %v269_v14, %v268_v13  ;;  %v353_v63 = vperm.slane %v340_v53, 0 }
  0x14   : > { %256 = vadd.xlane.f32.xlu0 %v255_v7  ;;  %v273_v12 = vadd.f32 %v267_v9, %v266_v8  ;;  %v270_v15 = vadd.f32 %v265_v11, %v264_v10  ;;  %v354_v8 = vperm.slane %v340_v53, 1 }
  0x16   : > { %274 = vadd.xlane.f32.xlu2 %v273_v12 }
  0x1b   : > { %271 = vadd.xlane.f32.xlu1 %v270_v15 }
  0x1c   : > { %259 = vadd.xlane.f32.xlu0 %v258_v16 }
  0x1e   : > { %277 = vadd.xlane.f32.xlu2 %v276_v17 }
  0x86   : > { %v263_v18 = vpop.xlane.xlu1 %262 }
  0x87   : > { %v257_v19 = vpop.xlane.xlu0 %256  ;;  %v631_v22 = vmul.f32 0.00390625, %v263_v18 }
  0x88   : > { %v279_v21 = vmul.f32 0.00390625, %v257_v19 }
  0x89   : > { %v275_v20 = vpop.xlane.xlu2 %274  ;;  %v287_v32 = vmul.f32 %v631_v22, %v631_v22  ;;  %v298_v55 = vsub.f32 %v601_v0, %v631_v22  ;;  %v299_v13 = vsub.f32 %v603_v1, %v631_v22 }
  0x8a   : > { %v285_v25 = vmul.f32 %v279_v21, %v279_v21  ;;  %v283_v30 = vmul.f32 0.00390625, %v275_v20  ;;  %v294_v56 = vsub.f32 %v605_v2, %v279_v21  ;;  %v295_v57 = vsub.f32 %v609_v4, %v279_v21 }
  0x8e   : > { %v272_v23 = vpop.xlane.xlu1 %271 }
  0x8f   : > { %v282_v24 = vmul.f32 0.00390625, %v272_v23  ;;  %v260_v26 = vpop.xlane.xlu0 %259 }
  0x90   : > { %v633_v27 = vmul.f32 0.00390625, %v260_v26 }
  0x91   : > { %v288_v28 = vsub.f32 %v282_v24, %v285_v25  ;;  %v278_v29 = vpop.xlane.xlu2 %277 }
  0x92   : > { %v286_v31 = vmul.f32 %v633_v27, %v633_v27  ;;  %v284_v33 = vmul.f32 0.00390625, %v278_v29  ;;  %v296_v4 = vsub.f32 %v611_v5, %v633_v27  ;;  %v297_v11 = vsub.f32 %v613_v6, %v633_v27 }
  0x93   : > { %v291_v34 = vmax.f32 %v288_v28, 0.0 }
  0x94   : > { %v289_v35 = vsub.f32 %v283_v30, %v286_v31  ;;  %v290_v36 = vsub.f32 %v284_v33, %v287_v32 }
  0x95   : > { %v300_v37 = vadd.f32 1e-05, %v291_v34 }
  0x96   : > { %v292_v38 = vmax.f32 %v289_v35, 0.0  ;;  %v293_v39 = vmax.f32 %v290_v36, 0.0 }
  0x97   : > { %525 = vrsqrt.f32 %v300_v37  ;;  %vm309_vm1 = vweird.f32 %v300_v37 }
  0x98   : > { %v301_v40 = vadd.f32 1e-05, %v292_v38  ;;  %v302_v41 = vadd.f32 1e-05, %v293_v39 }
  0x9a   : > { %527 = vrsqrt.f32 %v301_v40  ;;  %vm319_vm5 = vweird.f32 %v301_v40  ;;  %vm329_vm7 = vweird.f32 %v302_v41 }
  0x9b   : > { %529 = vrsqrt.f32 %v302_v41 }
  0x9d   : > { %v526_v42 = vpop.eup %525 }
  0x9e   : > { %v304_v43 = vmul.f32 %v526_v42, %v300_v37  ;;  %vm310_vm0 = vweird.f32 %v526_v42 }
  0x9f   : > { %vm311_vm2 = vmor %vm309_vm1, %vm310_vm0 }
  0xa0   : > { %v528_v44 = vpop.eup %527  ;;  %v305_v45 = vmul.f32 %v526_v42, %v304_v43 }
  0xa1   : > { %v530_v46 = vpop.eup %529  ;;  %v314_v47 = vmul.f32 %v528_v44, %v301_v40  ;;  %vm320_vm3 = vweird.f32 %v528_v44 }
  0xa2   : > { %v306_v48 = vmul.f32 0.5, %v305_v45  ;;  %v324_v49 = vmul.f32 %v530_v46, %v302_v41  ;;  %vm330_vm4 = vweird.f32 %v530_v46  ;;  %vm321_vm6 = vmor %vm319_vm5, %vm320_vm3 }
  0xa3   : > { %v315_v51 = vmul.f32 %v528_v44, %v314_v47  ;;  %vm331_vm8 = vmor %vm329_vm7, %vm330_vm4 }
  0xa4   : > { %v307_v52 = vsub.f32 1.5, %v306_v48  ;;  %v325_v54 = vmul.f32 %v530_v46, %v324_v49 }
  0xa5   : > { %v316_v58 = vmul.f32 0.5, %v315_v51 }
  0xa6   : > { %v308_v59 = vmul.f32 %v526_v42, %v307_v52  ;;  %v326_v61 = vmul.f32 0.5, %v325_v54 }
  0xa7   : > { %v317_v3 = vsub.f32 1.5, %v316_v58 }
  0xa8   : > { %v312_v7 = vsel %vm311_vm2, %v526_v42, %v308_v59  ;;  %v327_v9 = vsub.f32 1.5, %v326_v61 }
  0xa9   : > { %v333_v0 = vmul.f32 %v312_v7, %v294_v56  ;;  %v334_v10 = vmul.f32 %v312_v7, %v295_v57  ;;  %v318_v2 = vmul.f32 %v528_v44, %v317_v3 }
  0xaa   : > { %v328_v12 = vmul.f32 %v530_v46, %v327_v9 }
  0xab   : > { %v346_v14 = vmul.f32 %v342_v60, %v333_v0  ;;  %v347_v15 = vmul.f32 %v343_v62, %v334_v10  ;;  %v322_v16 = vsel %vm321_vm6, %v528_v44, %v318_v2 }
  0xac   : > { %v335_v17 = vmul.f32 %v322_v16, %v296_v4  ;;  %v336_v5 = vmul.f32 %v322_v16, %v297_v11  ;;  %v332_v18 = vsel %vm331_vm8, %v530_v46, %v328_v12 }
  0xad   : > { %v357_v19 = vadd.f32 %v353_v63, %v346_v14  ;;  %v358_v6 = vadd.f32 %v354_v8, %v347_v15  ;;  %v337_v20 = vmul.f32 %v332_v18, %v298_v55  ;;  %v338_v21 = vmul.f32 %v332_v18, %v299_v13 }
  0xae   : > { %v348_v23 = vmul.f32 %v342_v60, %v335_v17  ;;  %v349_v24 = vmul.f32 %v343_v62, %v336_v5 }
  0xaf   : > { %363 = vst [vmem:[%s247_s29] sm:$0xff] %v357_v19  ;;  %v350_v1 = vmul.f32 %v342_v60, %v337_v20  ;;  %v351_v22 = vmul.f32 %v343_v62, %v338_v21 }
  0xb0   : > { %364 = vst [vmem:[%s247_s29 + $0x8] sm:$0xff] %v358_v6  ;;  %v359_v25 = vadd.f32 %v353_v63, %v348_v23  ;;  %v360_v26 = vadd.f32 %v354_v8, %v349_v24 }
  0xb1   : > { %v361_v27 = vadd.f32 %v353_v63, %v350_v1  ;;  %v362_v28 = vadd.f32 %v354_v8, %v351_v22 }
  0xb2   : > { %365 = vst [vmem:[%s247_s29 + $0x10] sm:$0xff] %v359_v25 }
  0xb3   : > { %366 = vst [vmem:[%s247_s29 + $0x18] sm:$0xff] %v360_v26 }
  0xb4   : > { %367 = vst [vmem:[%s247_s29 + $0x20] sm:$0xff] %v361_v27 }
  0xb5   : > { %368 = vst [vmem:[%s247_s29 + $0x28] sm:$0xff] %v362_v28 }
  0xb6 PF: > { %s13_s14 = sadd.s32 1, %s553_s14   ;;  %s674_s12 = smov %s549_s13 }
  0xb7   : > { %p10_p5 = scmp.ge.s32.totalorder %s13_s14, 4   ;;  %s675_s13 = smov %s677_s15 }
  0xb9   :  { %12 = sbr.rel (!%p10_p5) target bundleno = 2 (0x2), region = 68 }

</bundles_post_ra>
